<compile_context>
chip_gen: v7x
topology: tpu7x:2x2x1
jax: 0.10.0
libtpu: 0.0.40
codegen_flags: <defaults>
</compile_context>

<pallas_src>
import jax
import jax.numpy as jnp
from jax import lax
from jax.experimental import pallas as pl
from jax.experimental.pallas import tpu as pltpu


# ---------------------------------------------------------------------------
# Kernel bodies
# ---------------------------------------------------------------------------

def _linear_prep_kernel_direct(x_ref, w_ref, o_ref):
    """Single-K-tile path: o = x_tile @ w_tile.T, written straight to the output block.

    x_ref: (tile_n, K)       w_ref: (tile_out, K)  (torch layout)   o_ref: (tile_n, tile_out)
    """
    o_ref[...] = lax.dot_general(
        x_ref[...],
        w_ref[...],
        dimension_numbers=(((1,), (1,)), ((), ())),   # contract input_dim of both
        preferred_element_type=jnp.float32,
    ).astype(o_ref.dtype)


def _linear_prep_kernel_acc(x_ref, w_ref, o_ref, acc_ref):
    """K-split path: acc += x_tile @ w_tile.T across the (last, 'arbitrary') K grid axis."""
    k = pl.program_id(2)

    @pl.when(k == 0)
    def _init():
        acc_ref[...] = jnp.zeros_like(acc_ref)

    acc_ref[...] += lax.dot_general(
        x_ref[...],
        w_ref[...],
        dimension_numbers=(((1,), (1,)), ((), ())),
        preferred_element_type=jnp.float32,
    )

    @pl.when(k == pl.num_programs(2) - 1)
    def _finalize():
        o_ref[...] = acc_ref[...].astype(o_ref.dtype)


# ---------------------------------------------------------------------------
# Wrapper
# ---------------------------------------------------------------------------

def _round_up(x, m):
    return (x + m - 1) // m * m


def linear_prep_forward(ids, feats, weight, *, tile_n=None):
    """LinearPrep.forward(ids, feats): returns feats @ weight.T (no bias).

    `ids` is accepted for API parity with the torch module but is unused.
    `weight` has torch layout (output_dim, input_dim).
    """
    del ids  # unused, matches PyTorch forward

    n, input_dim = feats.shape
    output_dim, in_dim_w = weight.shape
    assert in_dim_w == input_dim, "weight must have torch layout (output_dim, input_dim)"

    x_bytes = jnp.dtype(feats.dtype).itemsize
    w_bytes = jnp.dtype(weight.dtype).itemsize
    row_align = max(8, 32 // x_bytes)            # sublane packing (8 f32 / 16 bf16)

    # ---- K (input_dim) tiling: only split when the feature dim is genuinely large. ----
    if input_dim > 1024 and input_dim % 512 == 0:
        tile_k = 512
    elif input_dim > 1024 and input_dim % 256 == 0:
        tile_k = 256
    else:
        tile_k = input_dim
    grid_k = input_dim // tile_k

    # ---- output_dim tiling: MXU-native 256-wide (lane-dense stores) for big out dims. ----
    if output_dim > 512 and output_dim % 256 == 0:
        tile_out = 256
    else:
        tile_out = output_dim
    grid_o = output_dim // tile_o if (tile_o := tile_out) == 0 else output_dim // tile_out

    # ---- Row (N) tiling: size the tile from a VMEM budget (bigger tile -> fewer grid
    #      steps -> less per-step overhead), keep it double-buffer friendly. ----
    per_row_bytes = (2 * tile_k * x_bytes          # input tile, double-buffered
                     + 2 * tile_out * x_bytes      # output tile, double-buffered
                     + (tile_out * 4 if grid_k > 1 else 0))   # f32 accumulator
    if tile_n is None:
        budget = 8 << 20                           # ~8 MiB of row-proportional VMEM
        tile_n = max(row_align, min(4096, budget // max(per_row_bytes, 1)))
    tile_n = max(row_align, _round_up(min(tile_n, n), row_align))
    grid_n = pl.cdiv(n, tile_n)
    n_pad = grid_n * tile_n
    total_steps = grid_n * grid_o * grid_k

    # Pad the node count up to the tile grid; padded rows are zeros, sliced off below.
    feats_p = feats if n_pad == n else jnp.pad(feats, ((0, n_pad - n), (0, 0)))

    use_k_axis = grid_k > 1
    if use_k_axis:
        grid = (grid_n, grid_o, grid_k)
        x_map = lambda i, j, k: (i, k)
        w_map = lambda i, j, k: (j, k)
        o_map = lambda i, j, k: (i, j)
        dim_sem = ("parallel", "parallel", "arbitrary")
        kernel = _linear_prep_kernel_acc
        scratch = [pltpu.VMEM((tile_n, tile_out), jnp.float32)]
    else:
        grid = (grid_n, grid_o)
        x_map = lambda i, j: (i, 0)
        w_map = lambda i, j: (j, 0)
        o_map = lambda i, j: (i, j)
        dim_sem = ("parallel", "parallel")
        kernel = _linear_prep_kernel_direct
        scratch = []

    # Weight tile spec (torch layout, no transpose copy in the wrapper). If the weight
    # block is constant across the whole grid, single-buffer it to halve its VMEM.
    w_const = (grid_o == 1 and grid_k == 1)
    if w_const and total_steps > 1:
        w_spec = pl.BlockSpec((tile_out, tile_k), w_map, pipeline_mode=pl.Buffered(1))
        w_bufs = 1
    else:
        w_spec = pl.BlockSpec((tile_out, tile_k), w_map)
        w_bufs = 2

    # VMEM budget: double-buffered feats/out tiles + weight tile(s) + optional accumulator.
    vmem_need = (2 * tile_n * tile_k * x_bytes
                 + w_bufs * tile_out * tile_k * w_bytes
                 + 2 * tile_n * tile_out * x_bytes
                 + (tile_n * tile_out * 4 if use_k_axis else 0))
    vmem_limit = int(max(16 << 20, min(2 * vmem_need, 48 << 20), vmem_need + (2 << 20)))

    cost = pl.CostEstimate(
        flops=2 * n * input_dim * output_dim,
        transcendentals=0,
        bytes_accessed=(n * input_dim * x_bytes
                        + output_dim * input_dim * w_bytes
                        + n * output_dim * x_bytes),
    )

    out = pl.pallas_call(
        kernel,
        out_shape=jax.ShapeDtypeStruct((n_pad, output_dim), feats.dtype),
        grid_spec=pltpu.PrefetchScalarGridSpec(
            num_scalar_prefetch=0,
            grid=grid,
            in_specs=[
                pl.BlockSpec((tile_n, tile_k), x_map),
                w_spec,
            ],
            out_specs=pl.BlockSpec((tile_n, tile_out), o_map),
            scratch_shapes=scratch,
        ),
        compiler_params=pltpu.CompilerParams(
            dimension_semantics=dim_sem,
            vmem_limit_bytes=vmem_limit,
        ),
        cost_estimate=cost,
    )(feats_p, weight)

    return out[:n] if n_pad != n else out


# ---------------------------------------------------------------------------
# Self-test
# ---------------------------------------------------------------------------

if __name__ == "__main__":
    key = jax.random.PRNGKey(0)
    k_feat, k_w, k_feat2, k_w2 = jax.random.split(key, 4)

    # Small shapes consistent with the module: N nodes, input_dim features, output_dim=32.
    n_nodes = 300      # deliberately NOT a multiple of the row tile -> exercises padding
    input_dim = 64
    output_dim = 32

    ids = jnp.arange(n_nodes, dtype=jnp.int32)
    feats = jax.random.normal(k_feat, (n_nodes, input_dim), dtype=jnp.float32)

    # nn.Linear-style init bound, torch layout (output_dim, input_dim).
    bound = 1.0 / (input_dim ** 0.5)
    weight = jax.random.uniform(
        k_w, (output_dim, input_dim), dtype=jnp.float32, minval=-bound, maxval=bound
    )

    ref = feats @ weight.T

    # Multi-tile pipelined path (grid_n = 3, rows padded 300 -> 384, Buffered(1) weight).
    out_tiled = jax.block_until_ready(
        linear_prep_forward(ids, feats, weight, tile_n=128))
    # Default adaptive tile-selection path (single row tile for this small N).
    out_default = jax.block_until_ready(
        linear_prep_forward(ids, feats, weight))

    assert out_tiled.shape == (n_nodes, output_dim)
    assert out_default.shape == (n_nodes, output_dim)
    assert jnp.allclose(out_tiled, ref, atol=1e-5, rtol=1e-5)
    assert jnp.allclose(out_default, ref, atol=1e-5, rtol=1e-5)

    # Larger-feature path: exercises the K-split accumulator kernel (grid_k > 1).
    input_dim2, output_dim2, n2 = 2048, 32, 257
    feats2 = jax.random.normal(k_feat2, (n2, input_dim2), dtype=jnp.float32)
    bound2 = 1.0 / (input_dim2 ** 0.5)
    weight2 = jax.random.uniform(
        k_w2, (output_dim2, input_dim2), dtype=jnp.float32, minval=-bound2, maxval=bound2
    )
    ref2 = feats2 @ weight2.T
    out2 = jax.block_until_ready(
        linear_prep_forward(jnp.arange(n2, dtype=jnp.int32), feats2, weight2))
    assert out2.shape == (n2, output_dim2)
    assert jnp.allclose(out2, ref2, atol=1e-4, rtol=1e-4)

    print("KERNEL_OK")
</pallas_src>

<mosaic_0001>
module attributes {stable_mosaic.version = 11 : i64} {
  func.func @_linear_prep_kernel_direct(%arg0: i32, %arg1: i32, %arg2: memref<128x64xf32, #tpu.memory_space<vmem>>, %arg3: memref<32x64xf32, #tpu.memory_space<vmem>>, %arg4: memref<128x32xf32, #tpu.memory_space<vmem>>) attributes {dimension_semantics = [#tpu.dimension_semantics<parallel>, #tpu.dimension_semantics<parallel>], iteration_bounds = array<i64: 3, 1>, scalar_prefetch = 0 : i64, scratch_operands = 0 : i64, tpu.core_type = #tpu.core_type<tc>, window_params = [{transform_indices = @transform_0, window_bounds = array<i64: 128, 64>}, {pipeline_mode = #tpu.pipeline_mode<synchronous>, transform_indices = @transform_1, window_bounds = array<i64: 32, 64>}, {transform_indices = @transform_2, window_bounds = array<i64: 128, 32>}]} {
    %c0 = arith.constant 0 : index
    %c0_0 = arith.constant 0 : index
    %0 = vector.load %arg2[%c0, %c0_0] : memref<128x64xf32, #tpu.memory_space<vmem>>, vector<128x64xf32>
    %c0_1 = arith.constant 0 : index
    %c0_2 = arith.constant 0 : index
    %1 = vector.load %arg3[%c0_1, %c0_2] : memref<32x64xf32, #tpu.memory_space<vmem>>, vector<32x64xf32>
    %cst = arith.constant dense<0.000000e+00> : vector<128x32xf32>
    %2 = tpu.matmul %0, %1, %cst {dimension_numbers = #tpu.dot_dimension_numbers<[1], [1], [0], [0], [0, 0, 1, 0], [], []>} : vector<128x64xf32>, vector<32x64xf32>, vector<128x32xf32> -> vector<128x32xf32>
    %c0_3 = arith.constant 0 : index
    %c0_4 = arith.constant 0 : index
    %3 = vector.load %arg4[%c0_3, %c0_4] : memref<128x32xf32, #tpu.memory_space<vmem>>, vector<128x32xf32>
    tpu.vector_store %arg4[%c0_3, %c0_4], %2 {strides = array<i32>} : memref<128x32xf32, #tpu.memory_space<vmem>>, vector<128x32xf32>,
    return
  }
  func.func @transform_0(%arg0: i32, %arg1: i32) -> (i32, i32) {
    %c0_i32 = arith.constant 0 : i32
    %c0_i32_0 = arith.constant 0 : i32
    return %arg0, %c0_i32 : i32, i32
  }
  func.func @transform_1(%arg0: i32, %arg1: i32) -> (i32, i32) {
    %c0_i32 = arith.constant 0 : i32
    %c0_i32_0 = arith.constant 0 : i32
    return %arg1, %c0_i32 : i32, i32
  }
  func.func @transform_2(%arg0: i32, %arg1: i32) -> (i32, i32) {
    %c0_i32 = arith.constant 0 : i32
    return %arg0, %arg1 : i32, i32
  }
}

</mosaic_0001>

<bundles_post_ra>
// kernel: tpu_custom_call.1
= control target key start
LH: loop header
LB: loop body
LE: loop exit
PB: predicated region body
PF: predicated region fallthrough
CT: control target
= control target key end

     0   :  { %s685_s9 = smov 0   ;;  %s687_s10 = smov 0   ;;  %s827_s0 = inlined_call_operand.vmem [shape: f32[384,64], index: 0, kind: input, shape index: {}]   ;;  %s828_s1 = inlined_call_operand.vmem [shape: f32[32,64], index: 1, kind: input, shape index: {}]   ;;  %s829_s2 = inlined_call_operand.vmem [shape: f32[384,32], index: 2, kind: output, shape index: {}]  }
   0x1   :  { %s689_s11 = smov 0  }
   0x2 LB: > { %s24_s12 = sadd.s32 1, %s664_s10  ;;  %p527_p0 = scmp.ge.s32.totalorder %s668_s11, 1  ;;  %s668_s11 = sphi %s689_s11, %s12_s11   ;;  %s664_s10 = sphi %s687_s10, %s833_s10   ;;  %s660_s9 = sphi %s685_s9, %s832_s9  }
   0x3   : > { %p26_p1 = scmp.ge.s32.totalorder %s24_s12, 3  ;;  %p138_p2 = scmp.lt.s32.totalorder %s668_s11, 4 }
   0x5   : > { %s835_s12 = smov (%p26_p1, %s24_s12), 0  ;;  %p139_p3 = pnand %p527_p0, %p138_p2 }
   0x6   : > { %v205_v0 = vld [vmem:[%s828_s1] sm:$0xff] (!%p139_p3)  ;;  %v206_v1 = vld [vmem:[%s828_s1 + $0x8] sm:$0xff] (!%p139_p3)  ;;  %vm209_vm0 = vcmask (!%p139_p3), 523264   ;;  %v207_v2 = vld [vmem:[%s828_s1 + $0x10] sm:$0xff] (!%p139_p3)  ;;  %s528_s19 = sshll.u32 (!%p139_p3), %s660_s9, 4  ;;  %vm415_vm2 = vcmask (!%p139_p3), 261120  }
   0x7   : > { %142 = sbr.rel (%p139_p3) target bundleno = 252 (0xfc), region = 28  ;;  %v606_v3 = vpack.c.bf16 (!%p139_p3), %v206_v1, %v205_v0  ;;  %vm714_vm1 = vmpackc.low (!%p139_p3), %vm209_vm0, %vm209_vm0  ;;  %v208_v5 = vld [vmem:[%s828_s1 + $0x18] sm:$0xff] (!%p139_p3)  ;;  %p169_p4 = scmp.lt.s32.totalorder (!%p139_p3), %s528_s19, 47 }
   0x8   : > { %v612_v6 = vpack.c.bf16 (!%p139_p3), %v208_v5, %v207_v2 }
   0x9   : > { %608 = vmatprep.subr.msk.bf16.mxu0 (!%p139_p3), %vm714_vm1, %v606_v3  ;;  %618 = vmatprep.subr.msk.bf16.mxu1 (!%p139_p3), %vm714_vm1, %v606_v3 }
   0xa   : > { %611 = vmatpush3.bf16.xpose.msk.msra.mxu0 (!%p139_p3), %vm714_vm1, %v606_v3  ;;  %620 = vmatpush3.bf16.xpose.msk.msra.mxu1 (!%p139_p3), %vm714_vm1, %v606_v3 }
   0xb   : > { %614 = vmatprep.subr.msk.bf16.mxu0 (!%p139_p3), %vm714_vm1, %v612_v6  ;;  %619 = vmatprep.subr.msk.bf16.mxu1 (!%p139_p3), %vm714_vm1, %v612_v6 }
   0xe   : > { %s837_s19 = smov (!%p169_p4, %s528_s19), 47 }
   0xf   : > { %s529_s22 = sshll.u32 %s837_s19, 3 }
  0x10   : > { %s741_s25 = scalar_lea.vmem %s827_s0, %s529_s22  ;;  %s784_s28 = scalar_lea.vmem %s829_s2, %s529_s22 }
  0x11   : > { %v189_v7 = vld [vmem:[%s741_s25] sm:$0xff]  ;;  %v190_v9 = vld [vmem:[%s741_s25 + $0x8] sm:$0xff]  ;;  %v191_v11 = vld [vmem:[%s741_s25 + $0x10] sm:$0xff] }
  0x12   : > { %v197_v8 = vld [vmem:[%s741_s25 + $0x40] sm:$0xff]  ;;  %582 = vmatprep.mubr.msk.f32.mxu0 %vm209_vm0, %v189_v7  ;;  %617 = vmatpush3.bf16.xpose.msk.msra.mxu0 %vm714_vm1, %v612_v6  ;;  %v198_v10 = vld [vmem:[%s741_s25 + $0x48] sm:$0xff]  ;;  %v199_v12 = vld [vmem:[%s741_s25 + $0x50] sm:$0xff] }
  0x13   : > { %594 = vmatprep.mubr.msk.f32.mxu1 %vm209_vm0, %v197_v8  ;;  %621 = vmatpush3.bf16.xpose.msk.msra.mxu1 %vm714_vm1, %v612_v6  ;;  %v192_v13 = vld [vmem:[%s741_s25 + $0x18] sm:$0xff]  ;;  %v193_v15 = vld [vmem:[%s741_s25 + $0x20] sm:$0xff]  ;;  %v194_v17 = vld [vmem:[%s741_s25 + $0x28] sm:$0xff] }
  0x14   : > { %v200_v14 = vld [vmem:[%s741_s25 + $0x58] sm:$0xff]  ;;  %v201_v16 = vld [vmem:[%s741_s25 + $0x60] sm:$0xff]  ;;  %v202_v18 = vld [vmem:[%s741_s25 + $0x68] sm:$0xff] }
  0x15   : > { %v195_v19 = vld [vmem:[%s741_s25 + $0x30] sm:$0xff]  ;;  %v196_v21 = vld [vmem:[%s741_s25 + $0x38] sm:$0xff] }
  0x16   : > { %v203_v20 = vld [vmem:[%s741_s25 + $0x70] sm:$0xff]  ;;  %v204_v22 = vld [vmem:[%s741_s25 + $0x78] sm:$0xff] }
  0x19   : > { %583 = vmatmul.mubr.msk.f32.vlgmr.msra.gmra.mrb[0].mxu0 %vm209_vm0, %v190_v9 }
  0x1a   : > { %595 = vmatmul.mubr.msk.f32.vlgmr.msra.gmra.mrb[0].mxu1 %vm209_vm0, %v198_v10  ;;  %585 = vmatprep.mubr.msk.f32.mxu0 %vm209_vm0, %v191_v11 }
  0x1b   : > { %597 = vmatprep.mubr.msk.f32.mxu1 %vm209_vm0, %v199_v12 }
  0x1d   : > { %586 = vmatmul.mubr.msk.f32.gmra.mrb[2].mxu0 %vm209_vm0, %v192_v13 }
  0x1e   : > { %598 = vmatmul.mubr.msk.f32.gmra.mrb[2].mxu1 %vm209_vm0, %v200_v14  ;;  %588 = vmatprep.mubr.msk.f32.mxu0 %vm209_vm0, %v193_v15 }
  0x1f   : > { %600 = vmatprep.mubr.msk.f32.mxu1 %vm209_vm0, %v201_v16 }
  0x21   : > { %589 = vmatmul.mubr.msk.f32.gmra.mrb[4].mxu0 %vm209_vm0, %v194_v17 }
  0x22   : > { %601 = vmatmul.mubr.msk.f32.gmra.mrb[4].mxu1 %vm209_vm0, %v202_v18  ;;  %591 = vmatprep.mubr.msk.f32.mxu0 %vm209_vm0, %v195_v19 }
  0x23   : > { %603 = vmatprep.mubr.msk.f32.mxu1 %vm209_vm0, %v203_v20 }
  0x25   : > { %592 = vmatmul.mubr.msk.f32.gmra.mrb[6].mxu0 %vm209_vm0, %v196_v21 }
  0x26   : > { %604 = vmatmul.mubr.msk.f32.gmra.mrb[6].mxu1 %vm209_vm0, %v204_v22 }
  0xec   : > { %v584_v23 = vpop.f32.mrb[0].mxu0 }
  0xed   : > { %v596_v24 = vpop.f32.mrb[0].mxu1  ;;  %417 = vst.msk [vmem:[%s784_s28 + $0x8] sm:$0xff] %vm415_vm2, %v584_v23  ;;  %v336_v25 = vpop.f32.mrb[1].mxu0 }
  0xee   : > { %425 = vst.msk [vmem:[%s784_s28 + $0x48] sm:$0xff] %vm415_vm2, %v596_v24  ;;  %v376_v26 = vpop.f32.mrb[1].mxu1  ;;  %416 = vst.msk [vmem:[%s784_s28] sm:$0xff] %vm415_vm2, %v336_v25 }
  0xef   : > { %424 = vst.msk [vmem:[%s784_s28 + $0x40] sm:$0xff] %vm415_vm2, %v376_v26 }
  0xf0   : > { %v587_v27 = vpop.f32.mrb[2].mxu0 }
  0xf1   : > { %v599_v28 = vpop.f32.mrb[2].mxu1  ;;  %419 = vst.msk [vmem:[%s784_s28 + $0x18] sm:$0xff] %vm415_vm2, %v587_v27  ;;  %v346_v29 = vpop.f32.mrb[3].mxu0 }
  0xf2   : > { %427 = vst.msk [vmem:[%s784_s28 + $0x58] sm:$0xff] %vm415_vm2, %v599_v28  ;;  %v386_v30 = vpop.f32.mrb[3].mxu1  ;;  %418 = vst.msk [vmem:[%s784_s28 + $0x10] sm:$0xff] %vm415_vm2, %v346_v29 }
  0xf3   : > { %426 = vst.msk [vmem:[%s784_s28 + $0x50] sm:$0xff] %vm415_vm2, %v386_v30 }
  0xf4   : > { %v590_v31 = vpop.f32.mrb[4].mxu0 }
  0xf5   : > { %v602_v32 = vpop.f32.mrb[4].mxu1  ;;  %421 = vst.msk [vmem:[%s784_s28 + $0x28] sm:$0xff] %vm415_vm2, %v590_v31  ;;  %v356_v33 = vpop.f32.mrb[5].mxu0 }
  0xf6   : > { %429 = vst.msk [vmem:[%s784_s28 + $0x68] sm:$0xff] %vm415_vm2, %v602_v32  ;;  %v396_v34 = vpop.f32.mrb[5].mxu1  ;;  %420 = vst.msk [vmem:[%s784_s28 + $0x20] sm:$0xff] %vm415_vm2, %v356_v33 }
  0xf7   : > { %428 = vst.msk [vmem:[%s784_s28 + $0x60] sm:$0xff] %vm415_vm2, %v396_v34 }
  0xf8   : > { %v593_v35 = vpop.f32.mrb[6].mxu0 }
  0xf9   : > { %v605_v36 = vpop.f32.mrb[6].mxu1  ;;  %423 = vst.msk [vmem:[%s784_s28 + $0x38] sm:$0xff] %vm415_vm2, %v593_v35  ;;  %v366_v37 = vpop.f32.mrb[7].mxu0 }
  0xfa   : > { %431 = vst.msk [vmem:[%s784_s28 + $0x78] sm:$0xff] %vm415_vm2, %v605_v36  ;;  %v406_v38 = vpop.f32.mrb[7].mxu1  ;;  %422 = vst.msk [vmem:[%s784_s28 + $0x30] sm:$0xff] %vm415_vm2, %v366_v37 }
  0xfb   : > { %430 = vst.msk [vmem:[%s784_s28 + $0x70] sm:$0xff] %vm415_vm2, %v406_v38 }
  0xfc PF: > { %s12_s11 = sadd.s32 1, %s668_s11   ;;  %s832_s9 = smov %s664_s10 }
  0xfd   : > { %p9_p5 = scmp.ge.s32.totalorder %s12_s11, 5   ;;  %s833_s10 = smov %s835_s12 }
  0xff   :  { %11 = sbr.rel (!%p9_p5) target bundleno = 2 (0x2), region = 61 }

</bundles_post_ra>
